<compile_context>
chip_gen: v6e
topology: v6e:2x2x1
jax: 0.10.0
libtpu: 0.0.40
codegen_flags: <defaults>
</compile_context>

<pallas_src>
import functools

import jax
import jax.numpy as jnp
from jax import lax
from jax.experimental import pallas as pl
from jax.experimental.pallas import tpu as pltpu


# -----------------------------------------------------------------------------
# Fake-quant helpers (PACT-style clamp -> round -> dequant).
# TODO(synk): the exact fms_mo activation quantizers (get_activation_quantizer /
# Qdynamic calibration, SAWB, fp8 modes) are not part of the provided snippet;
# this implements the standard asymmetric PACT fake-quant with optional zero
# alignment, which is what the default pact/pact+ modes reduce to.
# -----------------------------------------------------------------------------
def _quant_params(nbits, clip_val, clip_valn, non_neg, align_zero):
    """All constants are plain Python floats, folded at trace time."""
    cv = float(clip_val)
    cvn = 0.0 if non_neg else float(clip_valn)
    n_levels = float(2 ** nbits - 1)
    scale = (cv - cvn) / n_levels
    if align_zero:
        zp = round(-cvn / scale)
        cvn = -zp * scale
        cv = cvn + scale * n_levels
    return scale, cvn, cv


def _fake_quant(x, scale, cvn, cv):
    # Compute in bf16 for bf16 inputs (bf16 VALU on v6e/v7x; <=8-bit integer
    # codes are exactly representable in bf16), f32 otherwise.
    # TODO(synk): v5e has no bf16 VALU; an f32 compute path may be faster there.
    dt = jnp.bfloat16 if x.dtype == jnp.bfloat16 else jnp.float32
    xf = x.astype(dt)
    x_c = jnp.clip(xf, cvn, cv)
    q = jnp.round((x_c - cvn) * (1.0 / scale))
    return (q * scale + cvn).astype(x.dtype)


# -----------------------------------------------------------------------------
# Kernels
# -----------------------------------------------------------------------------
def _quant_operands(a, b, quant_m1, quant_m2, qp_m1, qp_m2):
    # Static Python flags -> path specialised at trace time.
    if quant_m1:
        a = _fake_quant(a, *qp_m1)
    if quant_m2:
        b = _fake_quant(b, *qp_m2)
    # TODO(synk): for <=8-bit configs on v5e/v6e a true int8 MXU matmul with a
    # rank-1 zero-point/scale correction at the flush would be faster still;
    # kept in the input dtype here (v7x has no integer MXU and the asymmetric
    # correction changes numerics).
    return a, b


def _qbmm_kernel_direct(a_ref, b_ref, o_ref, *, quant_m1, quant_m2,
                        qp_m1, qp_m2):
    """Single-K-step fast path: no accumulator scratch, store dot directly."""
    a, b = _quant_operands(a_ref[...], b_ref[...],
                           quant_m1, quant_m2, qp_m1, qp_m2)
    o_ref[...] = lax.dot_general(
        a, b,
        dimension_numbers=(((2,), (1,)), ((0,), (0,))),
        preferred_element_type=jnp.float32).astype(o_ref.dtype)


def _qbmm_kernel_acc(a_ref, b_ref, o_ref, acc_ref, *, quant_m1, quant_m2,
                     qp_m1, qp_m2):
    """Multi-K-step path: f32 VMEM accumulator, init at k==0, flush at last k."""
    k = pl.program_id(3)
    a, b = _quant_operands(a_ref[...], b_ref[...],
                           quant_m1, quant_m2, qp_m1, qp_m2)
    partial = lax.dot_general(
        a, b,
        dimension_numbers=(((2,), (1,)), ((0,), (0,))),
        preferred_element_type=jnp.float32)

    @pl.when(k == 0)
    def _():
        acc_ref[...] = partial            # no zero-init store + reload

    @pl.when(k != 0)
    def _():
        acc_ref[...] = acc_ref[...] + partial

    @pl.when(k == pl.num_programs(3) - 1)
    def _():
        o_ref[...] = acc_ref[...].astype(o_ref.dtype)


# -----------------------------------------------------------------------------
# Tiling helpers
# -----------------------------------------------------------------------------
def _round_up(x, a):
    return ((x + a - 1) // a) * a


def _pick_tile(dim, target, align):
    """Pick a block size for `dim`: the full dim when it fits the target,
    else the largest `align`-multiple divisor <= target, else an aligned tile
    with `dim` padded up to a multiple of it. Returns (tile, padded_dim)."""
    target = max(1, min(int(dim), int(target)))
    if dim <= target:
        return dim, dim
    t = (target // align) * align
    while t >= align:
        if dim % t == 0:
            return t, dim
        t -= align
    t = max(align, (target // align) * align)
    return t, _round_up(dim, t)


def _largest_divisor_leq(n, limit):
    limit = max(1, min(n, int(limit)))
    for d in range(limit, 0, -1):
        if n % d == 0:
            return d
    return 1


def _vmem_budget_bytes():
    """Usable VMEM budget for this chip generation, leaving headroom for
    Mosaic internal scratch / double-buffering (important on v7x's 64 MiB)."""
    try:
        cap = int(pltpu.get_tpu_info().vmem_capacity_bytes)
    except Exception:
        cap = 64 << 20  # conservative fallback: assume v7x
    return max(16 << 20, min(cap - (8 << 20), (cap * 3) // 4))


# -----------------------------------------------------------------------------
# Module wrapper
# -----------------------------------------------------------------------------
class QBmmPallas:
    """JAX/Pallas equivalent of fms_mo QBmm (replaceBmm=True, inference path)."""

    def __init__(self, num_bits_m1=32, num_bits_m2=32,
                 m1_unidirectional=False, m2_unidirectional=False,
                 m1_clip_init_val=1.0, m1_clip_init_valn=-1.0,
                 m2_clip_init_val=1.0, m2_clip_init_valn=-1.0,
                 align_zero=True, tile_targets=None):
        self.num_bits_m1 = num_bits_m1
        self.num_bits_m2 = num_bits_m2
        # Qbypass when bits in {32, 16}, same as the PyTorch module.
        self.quant_m1 = num_bits_m1 not in (32, 16)
        self.quant_m2 = num_bits_m2 not in (32, 16)
        self.qp_m1 = _quant_params(num_bits_m1, m1_clip_init_val,
                                   m1_clip_init_valn, m1_unidirectional,
                                   align_zero) if self.quant_m1 else None
        self.qp_m2 = _quant_params(num_bits_m2, m2_clip_init_val,
                                   m2_clip_init_valn, m2_unidirectional,
                                   align_zero) if self.quant_m2 else None
        # Optional (tm, tn, tk) target override (mainly for testing tiled paths).
        self.tile_targets = tile_targets

    def __call__(self, m1, m2):
        # m1: [..., M, K], m2: [..., K, N] with matching batch dims.
        assert m1.dtype == m2.dtype, "m1/m2 dtypes must match"
        assert m1.shape[:-2] == m2.shape[:-2], "batch dims must match"
        assert m1.shape[-1] == m2.shape[-2], "contraction dims must match"
        batch_dims = m1.shape[:-2]
        M, K = m1.shape[-2], m1.shape[-1]
        N = m2.shape[-1]
        G = 1
        for d in batch_dims:
            G *= d
        G = max(G, 1)
        dtype = m1.dtype
        itemsize = jnp.dtype(dtype).itemsize
        # dtype-aware sublane-pack alignment: 8 (f32) / 16 (bf16) / 32 (int8).
        m_align = max(8, 32 // itemsize)

        budget = _vmem_budget_bytes()

        # --- tile selection: prefer full M/N/K (operands fetched once) when
        #     the double-buffered working set fits the per-generation budget ---
        if self.tile_targets is not None:
            cand_list = [tuple(self.tile_targets)]
        else:
            cand_list = [
                (M, N, K), (M, N, 1024), (M, N, 512),
                (2048, 2048, 512), (1024, 1024, 512),
                (512, 512, 512), (512, 512, 256),
                (256, 256, 256), (128, 256, 256),
                (128, 128, 256), (128, 128, 128),
            ]

        chosen = None
        for (ctm, ctn, ctk) in cand_list:
            tm, Mp = _pick_tile(M, ctm, m_align)
            tn, Np = _pick_tile(N, ctn, 128)
            tk, Kp = _pick_tile(K, ctk, 128)
            k_steps = Kp // tk
            acc_b = tm * tn * 4 if k_steps > 1 else 0
            need1 = 2 * (tm * tk + tk * tn + tm * tn) * itemsize + acc_b
            chosen = (tm, tn, tk, Mp, Np, Kp, k_steps)
            if need1 + (2 << 20) <= budget:
                break
        tm, tn, tk, Mp, Np, Kp, k_steps = chosen

        # --- fold small heads into one grid step (amortise ~0.35us/step), but
        #     keep >= 2 steps on a parallel axis so both v7x TCs get work -----
        gb = 1
        if M <= 128 and N <= 128 and G > 1 and Mp == M and Np == N:
            per_batch = (2 * (tm * tk + tk * tn + tm * tn) * itemsize
                         + (tm * tn * 4 if k_steps > 1 else 0))
            gb_cap = max(1, (budget - (2 << 20)) // max(per_batch, 1))
            gb_limit = min(max(1, 512 // max(M, 1)), gb_cap)
            if (Mp // tm) * (Np // tn) == 1 and G >= 2:
                gb_limit = min(gb_limit, max(1, G // 2))
            gb = _largest_divisor_leq(G, gb_limit)

        # --- quant placement: in-kernel only when each operand tile is visited
        #     exactly once (no VALU recomputation across i/j revisits) and no K
        #     padding; otherwise pre-quantize once in a cheap wrapper pass -----
        rev_a = Np // tn   # times an m1 tile's quant would re-run (once per j)
        rev_b = Mp // tm   # times an m2 tile's quant would re-run (once per i)
        prequant_m1 = self.quant_m1 and (rev_a > 1 or Kp != K)
        prequant_m2 = self.quant_m2 and (rev_b > 1 or Kp != K)
        kq_m1 = self.quant_m1 and not prequant_m1
        kq_m2 = self.quant_m2 and not prequant_m2

        m1f = m1.reshape(G, M, K)
        m2f = m2.reshape(G, K, N)
        if prequant_m1:
            m1f = _fake_quant(m1f, *self.qp_m1)
        if prequant_m2:
            m2f = _fake_quant(m2f, *self.qp_m2)

        # --- padding: zero pads contribute 0 to the dot (operands already
        #     dequantized when quant + K-padding coexist); padded output
        #     rows/cols are sliced off afterwards ----------------------------
        if Mp != M or Kp != K:
            m1f = jnp.pad(m1f, ((0, 0), (0, Mp - M), (0, Kp - K)))
        if Kp != K or Np != N:
            m2f = jnp.pad(m2f, ((0, 0), (0, Kp - K), (0, Np - N)))

        grid = (G // gb, Mp // tm, Np // tn, k_steps)

        if k_steps == 1:
            kernel = functools.partial(
                _qbmm_kernel_direct, quant_m1=kq_m1, quant_m2=kq_m2,
                qp_m1=self.qp_m1, qp_m2=self.qp_m2)
            scratch_shapes = ()
        else:
            kernel = functools.partial(
                _qbmm_kernel_acc, quant_m1=kq_m1, quant_m2=kq_m2,
                qp_m1=self.qp_m1, qp_m2=self.qp_m2)
            scratch_shapes = (pltpu.VMEM((gb, tm, tn), jnp.float32),)

        # --- VMEM hint: 2 buffers per pipelined operand + accumulator, capped
        #     below the per-generation budget (headroom for Mosaic scratch) ---
        a_bytes = gb * tm * tk * itemsize
        b_bytes = gb * tk * tn * itemsize
        o_bytes = gb * tm * tn * itemsize
        acc_bytes = gb * tm * tn * 4 if k_steps > 1 else 0
        need = 2 * (a_bytes + b_bytes + o_bytes) + acc_bytes + (2 << 20)
        vmem_limit = int(min(max(need, 16 << 20), budget))

        cost = pl.CostEstimate(
            flops=2 * G * Mp * Np * Kp,
            transcendentals=0,
            bytes_accessed=(G * Mp * Kp + G * Kp * Np + G * Mp * Np) * itemsize,
        )

        # TODO(synk): for N < 128 the output store is still a masked partial
        # store (vst.msk); a lane-dense repack of the output slab would need
        # extra wrapper-side transpose plumbing not implemented here.
        out = pl.pallas_call(
            kernel,
            out_shape=jax.ShapeDtypeStruct((G, Mp, Np), dtype),
            grid_spec=pltpu.PrefetchScalarGridSpec(
                num_scalar_prefetch=0,
                grid=grid,
                in_specs=[
                    pl.BlockSpec((gb, tm, tk), lambda g, i, j, k: (g, i, k)),
                    pl.BlockSpec((gb, tk, tn), lambda g, i, j, k: (g, k, j)),
                ],
                out_specs=pl.BlockSpec((gb, tm, tn),
                                       lambda g, i, j, k: (g, i, j)),
                scratch_shapes=scratch_shapes,
            ),
            compiler_params=pltpu.CompilerParams(
                dimension_semantics=("parallel", "parallel", "parallel",
                                     "arbitrary"),
                vmem_limit_bytes=vmem_limit,
            ),
            cost_estimate=cost,
        )(m1f, m2f)

        if Mp != M or Np != N:
            out = out[:, :M, :N]
        return out.reshape(*batch_dims, M, N)


# -----------------------------------------------------------------------------
# Pure-JAX reference
# -----------------------------------------------------------------------------
def _reference(m1, m2, mod: QBmmPallas):
    a, b = m1, m2
    if mod.quant_m1:
        a = _fake_quant(a, *mod.qp_m1)
    if mod.quant_m2:
        b = _fake_quant(b, *mod.qp_m2)
    out = jnp.matmul(a, b, preferred_element_type=jnp.float32)
    return out.astype(m1.dtype)


if __name__ == "__main__":
    key = jax.random.PRNGKey(0)
    k1, k2, k3, k4, k5, k6 = jax.random.split(key, 6)

    # --- small attention-like shapes (matches module usage) ------------------
    B, H, M, K, N = 2, 4, 8, 32, 8
    m1 = jax.random.normal(k1, (B, H, M, K), dtype=jnp.float32)
    m2 = jax.random.normal(k2, (B, H, K, N), dtype=jnp.float32)

    # Default QBmm config: num_bits 32/32 -> Qbypass -> plain matmul.
    qbmm_fp = QBmmPallas(num_bits_m1=32, num_bits_m2=32)
    out_fp = jax.block_until_ready(qbmm_fp(m1, m2))
    ref_fp = _reference(m1, m2, qbmm_fp)
    assert jnp.allclose(out_fp, ref_fp, atol=1e-5, rtol=1e-5)

    # 8-bit fake-quant config (PACT-style), in-kernel quant + single-K path.
    qbmm_q8 = QBmmPallas(num_bits_m1=8, num_bits_m2=8)
    out_q8 = jax.block_until_ready(qbmm_q8(m1, m2))
    ref_q8 = _reference(m1, m2, qbmm_q8)
    assert jnp.allclose(out_q8, ref_q8, atol=1e-4, rtol=1e-4)

    # --- moderate bf16 case: full-M/N tiles, fused in-kernel bf16 quant ------
    Bb, Hb, Mb, Kb, Nb = 1, 2, 1024, 128, 1024
    m1b = jax.random.normal(k3, (Bb, Hb, Mb, Kb), dtype=jnp.bfloat16)
    m2b = jax.random.normal(k4, (Bb, Hb, Kb, Nb), dtype=jnp.bfloat16)
    qbmm_bf = QBmmPallas(num_bits_m1=8, num_bits_m2=8)
    out_bf = jax.block_until_ready(qbmm_bf(m1b, m2b))
    ref_bf = _reference(m1b, m2b, qbmm_bf)
    assert jnp.allclose(out_bf.astype(jnp.float32), ref_bf.astype(jnp.float32),
                        atol=2e-2, rtol=2e-2)

    # --- awkward dims with forced small tiles: exercises the multi-K
    #     accumulator path, K-padding, and the wrapper pre-quant pass ---------
    Ba, Ha, Ma, Ka, Na = 2, 2, 48, 160, 72
    m1a = jax.random.normal(k5, (Ba, Ha, Ma, Ka), dtype=jnp.float32)
    m2a = jax.random.normal(k6, (Ba, Ha, Ka, Na), dtype=jnp.float32)
    qbmm_pad = QBmmPallas(num_bits_m1=8, num_bits_m2=8,
                          tile_targets=(32, 128, 128))
    out_pad = jax.block_until_ready(qbmm_pad(m1a, m2a))
    ref_pad = _reference(m1a, m2a, qbmm_pad)
    assert jnp.allclose(out_pad, ref_pad, atol=1e-4, rtol=1e-4)

    print("KERNEL_OK")
</pallas_src>

<mosaic_0001>
module attributes {stable_mosaic.version = 11 : i64} {
  func.func @_qbmm_kernel_direct(%arg0: i32, %arg1: i32, %arg2: i32, %arg3: i32, %arg4: memref<4x8x32xf32, #tpu.memory_space<vmem>>, %arg5: memref<4x32x8xf32, #tpu.memory_space<vmem>>, %arg6: memref<4x8x8xf32, #tpu.memory_space<vmem>>) attributes {dimension_semantics = [#tpu.dimension_semantics<parallel>, #tpu.dimension_semantics<parallel>, #tpu.dimension_semantics<parallel>, #tpu.dimension_semantics<arbitrary>], iteration_bounds = array<i64: 2, 1, 1, 1>, scalar_prefetch = 0 : i64, scratch_operands = 0 : i64, tpu.core_type = #tpu.core_type<tc>, window_params = [{transform_indices = @transform_0, window_bounds = array<i64: 4, 8, 32>}, {transform_indices = @transform_1, window_bounds = array<i64: 4, 32, 8>}, {transform_indices = @transform_2, window_bounds = array<i64: 4, 8, 8>}]} {
    %c0 = arith.constant 0 : index
    %c0_0 = arith.constant 0 : index
    %c0_1 = arith.constant 0 : index
    %0 = vector.load %arg4[%c0, %c0_0, %c0_1] : memref<4x8x32xf32, #tpu.memory_space<vmem>>, vector<4x8x32xf32>
    %c0_2 = arith.constant 0 : index
    %c0_3 = arith.constant 0 : index
    %c0_4 = arith.constant 0 : index
    %1 = vector.load %arg5[%c0_2, %c0_3, %c0_4] : memref<4x32x8xf32, #tpu.memory_space<vmem>>, vector<4x32x8xf32>
    %cst = arith.constant dense<0.000000e+00> : vector<4x8x8xf32>
    %2 = tpu.matmul %0, %1, %cst {dimension_numbers = #tpu.dot_dimension_numbers<[2], [1], [1], [2], [0, 0, 0, 1, 1, 2], [0], [0]>} : vector<4x8x32xf32>, vector<4x32x8xf32>, vector<4x8x8xf32> -> vector<4x8x8xf32>
    %c0_5 = arith.constant 0 : index
    %c0_6 = arith.constant 0 : index
    %c0_7 = arith.constant 0 : index
    %3 = vector.load %arg6[%c0_5, %c0_6, %c0_7] : memref<4x8x8xf32, #tpu.memory_space<vmem>>, vector<4x8x8xf32>
    tpu.vector_store %arg6[%c0_5, %c0_6, %c0_7], %2 {strides = array<i32>} : memref<4x8x8xf32, #tpu.memory_space<vmem>>, vector<4x8x8xf32>,
    return
  }
  func.func @transform_0(%arg0: i32, %arg1: i32, %arg2: i32, %arg3: i32) -> (i32, i32, i32) {
    %c0_i32 = arith.constant 0 : i32
    return %arg0, %arg1, %arg3 : i32, i32, i32
  }
  func.func @transform_1(%arg0: i32, %arg1: i32, %arg2: i32, %arg3: i32) -> (i32, i32, i32) {
    %c0_i32 = arith.constant 0 : i32
    return %arg0, %arg3, %arg2 : i32, i32, i32
  }
  func.func @transform_2(%arg0: i32, %arg1: i32, %arg2: i32, %arg3: i32) -> (i32, i32, i32) {
    %c0_i32 = arith.constant 0 : i32
    return %arg0, %arg1, %arg2 : i32, i32, i32
  }
}

</mosaic_0001>

<bundles_post_ra>
// kernel: tpu_custom_call.1
= control target key start
LH: loop header
LB: loop body
LE: loop exit
PB: predicated region body
PF: predicated region fallthrough
CT: control target
= control target key end

     0   :  { %7 = vsyncpa [#allocation3], 0  ;;  %s1100_s0 = inlined_call_operand.vmem [shape: f32[8,8,32], index: 0, kind: input, shape index: {}]   ;;  %s1101_s1 = inlined_call_operand.vmem [shape: f32[8,32,8], index: 1, kind: input, shape index: {}]   ;;  %s1102_s2 = inlined_call_operand.hbm [shape: f32[8,8,8], index: 2, kind: output, shape index: {}]  }
   0x1   :  { %9 = vsyncpa [#allocation3 + $0x1], 0  ;;  %s932_s9 = smov 0   ;;  %s934_s10 = smov 0  }
   0x2   :  { %s936_s11 = smov 0   ;;  %s938_s12 = smov 0  }
   0x3   :  { %s940_s13 = smov 0   ;;  %s942_s14 = smov 0  }
   0x4 LB: > { %s689_s15 = sadd.s32 4294967295, %s910_s14   ;;  %s690_s16 = sadd.s32 4294967294, %s910_s14   ;;  %s910_s14 = sphi %s942_s14, %s15_s14   ;;  %s906_s13 = sphi %s940_s13, %s1109_s13   ;;  %s902_s12 = sphi %s938_s12, %s1108_s12   ;;  %s898_s11 = sphi %s936_s11, %s1107_s11   ;;  %s894_s10 = sphi %s934_s10, %s1106_s10   ;;  %s890_s9 = sphi %s932_s9, %s1105_s9  }
   0x5   : > { %s41_s17 = sadd.s32 1, %s906_s13  ;;  %s112_s18 = sadd.s32 1, %s898_s11 }
   0x6   : > { %p43_p0 = scmp.ge.s32.totalorder %s41_s17, 2  ;;  %p122_p1 = scmp.ne.s32.totalorder %s898_s11, %s894_s10 }
   0x7   : > { %p123_p2 = scmp.eq.s32.totalorder %s689_s15, 1  ;;  %p128_p3 = scmp.ne.s32.totalorder %s894_s10, %s890_s9 }
   0x8   : > { %s1111_s17 = smov (%p43_p0, %s41_s17), 0  ;;  %p129_p5 = scmp.eq.s32.totalorder %s690_s16, 1 }
   0x9   : > { %p972_p4 = por %p123_p2, %p122_p1  ;;  %s105_s20 = ssub.s32 %s906_s13, %s1111_s17 }
   0xa   : > { %p693_p6 = scmp.ge.s32.totalorder %s910_s14, 1  ;;  %p110_p7 = scmp.eq.s32.totalorder %s105_s20, 0 }
   0xb   : > { %p979_p8 = por %p129_p5, %p128_p3  ;;  %p180_p9 = scmp.lt.s32.totalorder %s910_s14, 3 }
   0xc   : > { %s985_s22 = scalar_select %p110_p7, %s898_s11, %s112_s18  }
   0xd   : > { %p181_p10 = pnand %p693_p6, %p180_p9 }
   0xe   : > { %s695_s23 = sshll.u32 (!%p181_p10), %s902_s12, 2  ;;  %s218_s4 = sand.u32 (!%p181_p10), 1, %s894_s10  }
   0xf   : > { %184 = sbr.rel (%p181_p10) target bundleno = 250 (0xfa), region = 28  ;;  %p222_p11 = scmp.lt.s32.totalorder (!%p181_p10), %s695_s23, 7 }
  0x10   : > { %s694_s5 = sshll.u32 (!%p181_p10), %s218_s4, 5  ;;  %s710_s8 = sshll.u32 (!%p181_p10), %s902_s12, 9 }
  0x11   : > { %s220_s6 = scalar_lea.vmem (!%p181_p10), [#allocation2], %s694_s5  ;;  %s1053_s18 = scalar_lea.hbm (!%p181_p10), %s1102_s2, %s710_s8 }
  0x12   : > { %s583_s7 = sshll.u32 (!%p181_p10), %s220_s6, 4  ;;  %s1055_s20 = scalar_lea.sflag (!%p181_p10), [#allocation3], %s218_s4  ;;  %s1048_s7 = int_to_ptr.vmem [resolvable:$true] %s583_s7 }
  0x13   : > { %s914_s12 = smov (!%p181_p10), [#allocation2]  }
  0x14   : > { %v912_v0 = vmov 0.0   ;;  %vm913_vm0 = vmmov 0   ;;  %s1113_s23 = smov (!%p222_p11, %s695_s23), 7  ;;  %vm269_vm1 = vcmask 261120   ;;  %vm562_vm2 = vcmask 64512  }
  0x15   : > { %731 = vmatprep.subr.mxu0 %v912_v0  ;;  %742 = vmatprep.subr.mxu1 %v912_v0  ;;  %s709_s24 = sshll.u32 %s1113_s23, 5  ;;  %s696_s28 = sshll.u32 %s1113_s23, 3 }
  0x16   : > { %739 = vmatprep.mubr.msk.f32.mxu0 %vm913_vm0, %v912_v0  ;;  %750 = vmatprep.mubr.msk.f32.mxu1 %vm913_vm0, %v912_v0  ;;  %s997_s27 = scalar_lea.vmem %s1101_s1, %s709_s24  ;;  %s1010_s3 = scalar_lea.vmem %s1100_s0, %s696_s28 }
  0x17   : > { %v256_v1 = vld [vmem:[%s997_s27 + $0x18] sm:$0xff]  ;;  %v255_v3 = vld [vmem:[%s997_s27 + $0x10] sm:$0xff]  ;;  %v254_v5 = vld [vmem:[%s997_s27 + $0x8] sm:$0xff]  ;;  %s834_s23 = scalar_lea.vmem %s1048_s7, 512  ;;  %s838_s24 = sshll.u32 %s914_s12, 4  ;;  %s839_s24 = int_to_ptr.vmem [resolvable:$false] %s838_s24 }
  0x18   : > { %v260_v2 = vld [vmem:[%s997_s27 + $0x38] sm:$0xff]  ;;  %732 = vmatpush3.msra.mxu0 %v256_v1  ;;  %v259_v4 = vld [vmem:[%s997_s27 + $0x30] sm:$0xff]  ;;  %v258_v6 = vld [vmem:[%s997_s27 + $0x28] sm:$0xff]  ;;  %p835_p12 = scmp.ne.s32.totalorder %s1048_s7, %s834_s23  ;;  %s840_s25 = scalar_lea.vmem %s839_s24, 1024 }
  0x19   : > { %743 = vmatpush3.msra.mxu1 %v260_v2  ;;  %733 = vmatprep.subr.mxu0 %v912_v0  ;;  %v253_v7 = vld [vmem:[%s997_s27] sm:$0xff]  ;;  %v250_v10 = vld [vmem:[%s1010_s3 + $0x8] sm:$0xff]  ;;  %v264_v11 = vld [vmem:[%s997_s27 + $0x58] sm:$0xff]  ;;  %p841_p1 = scmp.lt.s32.totalorder %s1048_s7, %s839_s24  ;;  %p842_p2 = scmp.lt.s32.totalorder %s840_s25, %s834_s23 }
  0x1a   : > { %744 = vmatprep.subr.mxu1 %v912_v0  ;;  %734 = vmatpush3.msra.mxu0 %v255_v3  ;;  %v257_v8 = vld [vmem:[%s997_s27 + $0x20] sm:$0xff]  ;;  %v268_v12 = vld [vmem:[%s997_s27 + $0x78] sm:$0xff]  ;;  %v263_v13 = vld [vmem:[%s997_s27 + $0x50] sm:$0xff]  ;;  %p836_p13 = pnand %p835_p12, %p972_p4 }
  0x1b   : > { %745 = vmatpush3.msra.mxu1 %v259_v4  ;;  %735 = vmatprep.subr.mxu0 %v912_v0  ;;  %v249_v9 = vld [vmem:[%s1010_s3] sm:$0xff]  ;;  %v267_v14 = vld [vmem:[%s997_s27 + $0x70] sm:$0xff]  ;;  %v262_v15 = vld [vmem:[%s997_s27 + $0x48] sm:$0xff]  ;;  %p843_p3 = por %p842_p2, %p841_p1 }
  0x1c   : > { %746 = vmatprep.subr.mxu1 %v912_v0  ;;  %736 = vmatpush3.msra.mxu0 %v254_v5  ;;  %v266_v16 = vld [vmem:[%s997_s27 + $0x68] sm:$0xff]  ;;  %v261_v17 = vld [vmem:[%s997_s27 + $0x40] sm:$0xff]  ;;  %v251_v19 = vld [vmem:[%s1010_s3 + $0x10] sm:$0xff]  ;;  %p837_p0 = pneg %p836_p13 }
  0x1d   : > { %747 = vmatpush3.msra.mxu1 %v258_v6  ;;  %737 = vmatprep.subr.mxu0 %v912_v0  ;;  %v265_v18 = vld [vmem:[%s997_s27 + $0x60] sm:$0xff]  ;;  %v252_v20 = vld [vmem:[%s1010_s3 + $0x18] sm:$0xff] }
  0x1e   : > { %748 = vmatprep.subr.mxu1 %v912_v0  ;;  %738 = vmatpush3.msra.mxu0 %v253_v7  ;;  %p844_p5 = pnand %p843_p3, %p837_p0 }
  0x1f   : > { %749 = vmatpush3.msra.mxu1 %v257_v8  ;;  %740 = vmatmul.mubr.msk.f32.vlgmr.msra.gmra.mxu0 %vm269_vm1, %v249_v9 }
  0x20   : > { %751 = vmatmul.mubr.msk.f32.vlgmr.msra.gmra.mxu1 %vm269_vm1, %v250_v10  ;;  %753 = vmatprep.subr.mxu0 %v912_v0 }
  0x21   : > { %764 = vmatprep.subr.mxu1 %v912_v0  ;;  %754 = vmatpush3.msra.mxu0 %v264_v11 }
  0x22   : > { %765 = vmatpush3.msra.mxu1 %v268_v12  ;;  %755 = vmatprep.subr.mxu0 %v912_v0 }
  0x23   : > { %766 = vmatprep.subr.mxu1 %v912_v0  ;;  %756 = vmatpush3.msra.mxu0 %v263_v13 }
  0x24   : > { %767 = vmatpush3.msra.mxu1 %v267_v14  ;;  %757 = vmatprep.subr.mxu0 %v912_v0 }
  0x25   : > { %768 = vmatprep.subr.mxu1 %v912_v0  ;;  %758 = vmatpush3.msra.mxu0 %v262_v15 }
  0x26   : > { %769 = vmatpush3.msra.mxu1 %v266_v16  ;;  %759 = vmatprep.subr.mxu0 %v912_v0 }
  0x27   : > { %770 = vmatprep.subr.mxu1 %v912_v0  ;;  %760 = vmatpush3.msra.mxu0 %v261_v17 }
  0x28   : > { %761 = vmatprep.mubr.msk.f32.mxu0 %vm913_vm0, %v912_v0  ;;  %771 = vmatpush3.msra.mxu1 %v265_v18 }
  0x29   : > { %772 = vmatprep.mubr.msk.f32.mxu1 %vm913_vm0, %v912_v0  ;;  %762 = vmatmul.mubr.msk.f32.vlgmr.msra.gmra.mxu0 %vm269_vm1, %v251_v19 }
  0x2a   : > { %773 = vmatmul.mubr.msk.f32.vlgmr.msra.gmra.mxu1 %vm269_vm1, %v252_v20 }
  0xdf   : > { %v339_v21 = vpop.f32.mrf.mxu0 }
  0xe0   : > { %v412_v22 = vpop.f32.mrf.mxu1  ;;  %563 = vst.msk [vmem:[%s220_s6] sm:$0xff] %vm562_vm2, %v339_v21 }
  0xe1   : > { %564 = vst.msk [vmem:[%s220_s6 + $0x8] sm:$0xff] %vm562_vm2, %v412_v22  ;;  %v741_v23 = vpop.f32.mrf.mxu0 }
  0xe2   : > { %v752_v24 = vpop.f32.mrf.mxu1 }
  0xe9   : > { %v485_v25 = vpop.f32.mrf.mxu0 }
  0xea   : > { %v558_v26 = vpop.f32.mrf.mxu1  ;;  %565 = vst.msk [vmem:[%s220_s6 + $0x10] sm:$0xff] %vm562_vm2, %v485_v25 }
  0xeb   : > { %566 = vst.msk [vmem:[%s220_s6 + $0x18] sm:$0xff] %vm562_vm2, %v558_v26  ;;  %v763_v27 = vpop.f32.mrf.mxu0 }
  0xec   : > { %v774_v28 = vpop.f32.mrf.mxu1 }
  0xed   : > { %847 = shalt.err (!%p844_p5)
}
  0xee   : > { %s848_s26 = scalar_lea.hbm %s1053_s18, 512  ;;  %s852_s29 = scalar_lea.hbm %s1102_s2, 1024 }
  0xef   : > { %p849_p6 = scmp.ne.s32.totalorder %s1053_s18, %s848_s26  ;;  %p853_p10 = scmp.lt.s32.totalorder %s1053_s18, %s1102_s2 }
  0xf0   : > { %p854_p11 = scmp.lt.s32.totalorder %s852_s29, %s848_s26 }
  0xf1   : > { %p850_p7 = pnand %p849_p6, %p972_p4 }
  0xf2   : > { %p855_p12 = por %p854_p11, %p853_p10 }
  0xf3   : > { %p851_p9 = pneg %p850_p7 }
  0xf5   : > { %p856_p13 = pnand %p855_p12, %p851_p9 }
  0xf7   : > { %859 = shalt.err (!%p856_p13)
}
  0xf8   : > { %s915_s4 = smov 128   ;;  %s916_s5 = smov 8  }
  0xf9   : > { %775 = dma.vmem_to_hbm [thread:$0]  (%p972_p4), %s1048_s7, 512, %s1053_s18, %s1055_s20, %s915_s4, %s915_s4, %s916_s5  }
  0xfa PF: > { %p781_p0 = scmp.ge.s32.totalorder %s910_s14, 2  ;;  %s598_s6 = sand.u32 1, %s890_s9  }
  0xfb   : > { %s599_s8 = scalar_lea.sflag [#allocation3], %s598_s6 }
  0xfc   : > { %p778_p1 = pnand %p781_p0, %p979_p8 }
  0xfe   : > { %p779_p2 = pneg %p778_p1 }
 0x100   : > { %885 = dma.done.wait (%p779_p2), %s599_s8, 512  }
 0x101   : > { %887 = vsyncadd (%p779_p2), %s599_s8, 4294966784  ;;  %s15_s14 = sadd.s32 1, %s910_s14   ;;  %s1105_s9 = smov %s894_s10 }
 0x102   : > { %p12_p3 = scmp.ge.s32.totalorder %s15_s14, 4   ;;  %s1106_s10 = smov %s898_s11 }
 0x103   : > { %s1107_s11 = smov %s985_s22  ;;  %s1108_s12 = smov %s906_s13 }
 0x104   : > { %s1109_s13 = smov %s1111_s17  ;;  %14 = sbr.rel (!%p12_p3) target bundleno = 4 (0x4), region = 66 }
 0x109   :  { %604 = vsyncpa [#allocation3], 1 }
 0x10a   :  { %606 = vsyncpa [#allocation3 + $0x1], 1 }

</bundles_post_ra>
